<compile_context>
chip_gen: v6e
topology: v6e:2x2x1
jax: 0.10.0
libtpu: 0.0.40
codegen_flags: <defaults>
</compile_context>

<pallas_src>
import math
import functools

import jax
import jax.numpy as jnp
from jax import lax
from jax.experimental import pallas as pl
from jax.experimental.pallas import tpu as pltpu


# Preferred tile sizes (fall back to the full dimension when it does not
# divide evenly, which also keeps tiny test shapes legal w.r.t. the (8, 128)
# block-shape rule).
_TM_PREF = 256     # rows of x per projection step
_TN_PREF = 256     # output features per projection step (multiple of 128)
_TQ_PREF = 128     # query rows per attention step


def _pick_tile(dim, pref):
    if dim <= pref or dim % pref != 0:
        return dim
    return pref


# ----------------------------------------------------------------------------
# Fused Q/K/V projection (GPT-2 Conv1D x3):  q,k,v = x @ Wq/k/v + bq/k/v
# ----------------------------------------------------------------------------
def _qkv_proj_kernel(x_ref, wq_ref, wk_ref, wv_ref, bq_ref, bk_ref, bv_ref,
                     q_ref, k_ref, v_ref, *, compute_dtype):
    x = x_ref[...].astype(compute_dtype)
    for w_ref, b_ref, o_ref in ((wq_ref, bq_ref, q_ref),
                                (wk_ref, bk_ref, k_ref),
                                (wv_ref, bv_ref, v_ref)):
        y = jnp.dot(x, w_ref[...].astype(compute_dtype),
                    preferred_element_type=jnp.float32)
        o_ref[...] = (y + b_ref[...]).astype(o_ref.dtype)


def qkv_projection(x2d, wq, bq, wk, bk, wv, bv, compute_dtype=jnp.float32):
    """x2d: [N, nx]; w*: [nx, nf]; b*: [nf] -> (q, k, v) each [N, nf]."""
    N, nx = x2d.shape
    nf = wq.shape[1]
    tm = _pick_tile(N, _TM_PREF)
    tn = _pick_tile(nf, _TN_PREF)
    bq2, bk2, bv2 = bq.reshape(1, nf), bk.reshape(1, nf), bv.reshape(1, nf)

    w_spec = pl.BlockSpec((nx, tn), lambda i, j: (0, j))
    b_spec = pl.BlockSpec((1, tn), lambda i, j: (0, j))
    o_spec = pl.BlockSpec((tm, tn), lambda i, j: (i, j))
    out_sds = jax.ShapeDtypeStruct((N, nf), x2d.dtype)

    kern = functools.partial(_qkv_proj_kernel, compute_dtype=compute_dtype)
    return pl.pallas_call(
        kern,
        out_shape=(out_sds, out_sds, out_sds),
        grid=(pl.cdiv(N, tm), pl.cdiv(nf, tn)),
        in_specs=[
            pl.BlockSpec((tm, nx), lambda i, j: (i, 0)),
            w_spec, w_spec, w_spec,
            b_spec, b_spec, b_spec,
        ],
        out_specs=(o_spec, o_spec, o_spec),
        compiler_params=pltpu.CompilerParams(
            dimension_semantics=("parallel", "parallel")),
    )(x2d, wq, wk, wv, bq2, bk2, bv2)


# ----------------------------------------------------------------------------
# Generic tiled Conv1D:  y = x @ W + b   (used for the output projection)
# ----------------------------------------------------------------------------
def _matmul_bias_kernel(x_ref, w_ref, b_ref, o_ref, *, compute_dtype):
    y = jnp.dot(x_ref[...].astype(compute_dtype),
                w_ref[...].astype(compute_dtype),
                preferred_element_type=jnp.float32)
    o_ref[...] = (y + b_ref[...]).astype(o_ref.dtype)


def conv1d(x2d, w, b, compute_dtype=jnp.float32):
    """x2d: [N, nx], w: [nx, nf], b: [nf] -> [N, nf]."""
    N, nx = x2d.shape
    nf = w.shape[1]
    tm = _pick_tile(N, _TM_PREF)
    tn = _pick_tile(nf, _TN_PREF)
    b2d = b.reshape(1, nf)

    kern = functools.partial(_matmul_bias_kernel, compute_dtype=compute_dtype)
    return pl.pallas_call(
        kern,
        out_shape=jax.ShapeDtypeStruct((N, nf), x2d.dtype),
        grid=(pl.cdiv(N, tm), pl.cdiv(nf, tn)),
        in_specs=[
            pl.BlockSpec((tm, nx), lambda i, j: (i, 0)),
            pl.BlockSpec((nx, tn), lambda i, j: (0, j)),
            pl.BlockSpec((1, tn), lambda i, j: (0, j)),
        ],
        out_specs=pl.BlockSpec((tm, tn), lambda i, j: (i, j)),
        compiler_params=pltpu.CompilerParams(
            dimension_semantics=("parallel", "parallel")),
    )(x2d, w, b2d)


# ----------------------------------------------------------------------------
# Causal multi-head attention, heads split/merged inside the kernel.
#   s = (q * 1/sqrt(D)) @ k^T ;  s = where(causal, s, -10000.0)
#   p = softmax(s) ;  o = p @ v
# q/k/v/out stay in [B, S, E]; one grid step handles all heads of a q-tile.
# ----------------------------------------------------------------------------
def _attn_kernel(q_ref, k_ref, v_ref, o_ref, *,
                 num_heads, head_dim, q_tile, compute_dtype):
    qi = pl.program_id(1)

    q = q_ref[0]            # (tq, E)
    k = k_ref[0]            # (S, E)
    v = v_ref[0]            # (S, E)
    tq = q.shape[0]
    S = k.shape[0]

    # Fold 1/sqrt(head_dim) into q: O(tq*E) multiplies instead of O(tq*S).
    scale = jnp.float32(1.0 / math.sqrt(head_dim))
    qs = (q.astype(jnp.float32) * scale).astype(compute_dtype)
    kc = k.astype(compute_dtype)
    vc = v.astype(compute_dtype)

    # Causal mask built once per grid step and reused by every head.
    row = qi * q_tile + lax.broadcasted_iota(jnp.int32, (tq, S), 0)
    col = lax.broadcasted_iota(jnp.int32, (tq, S), 1)
    causal = col <= row
    masked_bias = jnp.float32(-10000.0)   # GPT-2 masked_bias semantics

    # Contract the last dims of q and k directly (no k.T materialized).
    qk_dnums = (((1,), (1,)), ((), ()))

    outs = []
    for h in range(num_heads):
        lo = h * head_dim
        hi = lo + head_dim
        qh = qs[:, lo:hi]                 # (tq, D)
        kh = kc[:, lo:hi]                 # (S, D)
        vh = vc[:, lo:hi]                 # (S, D)

        s = lax.dot_general(qh, kh, qk_dnums,
                            preferred_element_type=jnp.float32)   # (tq, S)
        s = jnp.where(causal, s, masked_bias)

        # Numerically stable softmax; divide moved to the EUP via reciprocal.
        m = jnp.max(s, axis=-1, keepdims=True)
        p = jnp.exp(s - m)
        denom = jnp.sum(p, axis=-1, keepdims=True)
        p = p * pl.reciprocal(denom, approx=True)

        oh = jnp.dot(p.astype(compute_dtype), vh,
                     preferred_element_type=jnp.float32)          # (tq, D)
        outs.append(oh)

    # Single lane-dense (tq, E) store.
    o_ref[0] = jnp.concatenate(outs, axis=-1).astype(o_ref.dtype)


def causal_attention(q, k, v, num_heads, head_dim, compute_dtype=jnp.float32):
    """q, k, v: [B, S, E] -> [B, S, E] (heads handled inside the kernel)."""
    B, S, E = q.shape
    tq = _pick_tile(S, _TQ_PREF)

    kern = functools.partial(
        _attn_kernel, num_heads=num_heads, head_dim=head_dim,
        q_tile=tq, compute_dtype=compute_dtype)

    return pl.pallas_call(
        kern,
        out_shape=jax.ShapeDtypeStruct((B, S, E), q.dtype),
        grid=(B, S // tq),
        in_specs=[
            pl.BlockSpec((1, tq, E), lambda b, i: (b, i, 0)),
            pl.BlockSpec((1, S, E), lambda b, i: (b, 0, 0)),
            pl.BlockSpec((1, S, E), lambda b, i: (b, 0, 0)),
        ],
        out_specs=pl.BlockSpec((1, tq, E), lambda b, i: (b, i, 0)),
        compiler_params=pltpu.CompilerParams(
            dimension_semantics=("parallel", "parallel")),
    )(q, k, v)


# ----------------------------------------------------------------------------
# GPT2Attention forward (layout glue is free reshapes only; no transposes)
# ----------------------------------------------------------------------------
def gpt2_attention_forward(hidden_states, params, num_heads,
                           compute_dtype=jnp.float32):
    # compute_dtype=jnp.bfloat16 recommended on v6e/v7x (f32 accumulation is
    # kept via preferred_element_type); keep f32 on v5e.
    B, S, E = hidden_states.shape
    head_dim = E // num_heads
    N = B * S

    x2d = hidden_states.reshape(N, E)

    q2d, k2d, v2d = qkv_projection(
        x2d, params["wq"], params["bq"], params["wk"], params["bk"],
        params["wv"], params["bv"], compute_dtype=compute_dtype)

    q = q2d.reshape(B, S, E)
    k = k2d.reshape(B, S, E)
    v = v2d.reshape(B, S, E)

    attn_out = causal_attention(q, k, v, num_heads, head_dim,
                                compute_dtype=compute_dtype)   # [B, S, E]

    out2d = conv1d(attn_out.reshape(N, E), params["wproj"], params["bproj"],
                   compute_dtype=compute_dtype)
    # TODO(synk): attn_dropout / resid_dropout are identity (eval mode);
    #             attention_mask!=None path not implemented.
    return out2d.reshape(B, S, E)


# ----------------------------------------------------------------------------
# Pure-JAX reference for validation
# ----------------------------------------------------------------------------
def reference_forward(hidden_states, params, num_heads):
    B, S, E = hidden_states.shape
    D = E // num_heads
    x = hidden_states.reshape(B * S, E)
    q = x @ params["wq"] + params["bq"]
    k = x @ params["wk"] + params["bk"]
    v = x @ params["wv"] + params["bv"]

    def split(t):
        return jnp.transpose(t.reshape(B, S, num_heads, D), (0, 2, 1, 3))

    qh, kh, vh = split(q), split(k), split(v)
    s = jnp.einsum("bhqd,bhkd->bhqk", qh, kh) / math.sqrt(D)
    causal = jnp.tril(jnp.ones((S, S), dtype=bool))[None, None]
    s = jnp.where(causal, s, jnp.float32(-10000.0))
    p = jax.nn.softmax(s, axis=-1)
    o = jnp.einsum("bhqk,bhkd->bhqd", p, vh)
    o = jnp.transpose(o, (0, 2, 1, 3)).reshape(B * S, E)
    o = o @ params["wproj"] + params["bproj"]
    return o.reshape(B, S, E)


if __name__ == "__main__":
    # Small config consistent with GPT2Attention: n_embd=32, n_head=4,
    # batch=2, seq=8.
    B, S, E, H = 2, 8, 32, 4

    key = jax.random.PRNGKey(0)
    kx, kq, kk, kv, kp = jax.random.split(key, 5)

    hidden_states = jax.random.normal(kx, (B, S, E), dtype=jnp.float32)

    params = {
        "wq": 0.02 * jax.random.normal(kq, (E, E), dtype=jnp.float32),
        "bq": jnp.zeros((E,), dtype=jnp.float32),
        "wk": 0.02 * jax.random.normal(kk, (E, E), dtype=jnp.float32),
        "bk": jnp.zeros((E,), dtype=jnp.float32),
        "wv": 0.02 * jax.random.normal(kv, (E, E), dtype=jnp.float32),
        "bv": jnp.zeros((E,), dtype=jnp.float32),
        "wproj": 0.02 * jax.random.normal(kp, (E, E), dtype=jnp.float32),
        "bproj": jnp.zeros((E,), dtype=jnp.float32),
    }

    out = gpt2_attention_forward(hidden_states, params, H)
    out = jax.block_until_ready(out)

    ref = reference_forward(hidden_states, params, H)
    assert out.shape == (B, S, E)
    # Tolerance accounts for the EUP approximate reciprocal in the softmax.
    assert jnp.allclose(out, ref, atol=2e-3, rtol=2e-3), "mismatch vs reference"

    print("KERNEL_OK")
</pallas_src>

<mosaic_0001>
module attributes {stable_mosaic.version = 11 : i64} {
  func.func @_qkv_proj_kernel(%arg0: i32, %arg1: i32, %arg2: memref<16x32xf32, #tpu.memory_space<vmem>>, %arg3: memref<32x32xf32, #tpu.memory_space<vmem>>, %arg4: memref<32x32xf32, #tpu.memory_space<vmem>>, %arg5: memref<32x32xf32, #tpu.memory_space<vmem>>, %arg6: memref<1x32xf32, #tpu.memory_space<vmem>>, %arg7: memref<1x32xf32, #tpu.memory_space<vmem>>, %arg8: memref<1x32xf32, #tpu.memory_space<vmem>>, %arg9: memref<16x32xf32, #tpu.memory_space<vmem>>, %arg10: memref<16x32xf32, #tpu.memory_space<vmem>>, %arg11: memref<16x32xf32, #tpu.memory_space<vmem>>) attributes {dimension_semantics = [#tpu.dimension_semantics<parallel>, #tpu.dimension_semantics<parallel>], iteration_bounds = array<i64: 1, 1>, scalar_prefetch = 0 : i64, scratch_operands = 0 : i64, tpu.core_type = #tpu.core_type<tc>, window_params = [{transform_indices = @transform_0, window_bounds = array<i64: 16, 32>}, {transform_indices = @transform_1, window_bounds = array<i64: 32, 32>}, {transform_indices = @transform_2, window_bounds = array<i64: 32, 32>}, {transform_indices = @transform_3, window_bounds = array<i64: 32, 32>}, {transform_indices = @transform_4, window_bounds = array<i64: 1, 32>}, {transform_indices = @transform_5, window_bounds = array<i64: 1, 32>}, {transform_indices = @transform_6, window_bounds = array<i64: 1, 32>}, {transform_indices = @transform_7, window_bounds = array<i64: 16, 32>}, {transform_indices = @transform_8, window_bounds = array<i64: 16, 32>}, {transform_indices = @transform_9, window_bounds = array<i64: 16, 32>}]} {
    %c0 = arith.constant 0 : index
    %c0_0 = arith.constant 0 : index
    %0 = vector.load %arg2[%c0, %c0_0] : memref<16x32xf32, #tpu.memory_space<vmem>>, vector<16x32xf32>
    %c0_1 = arith.constant 0 : index
    %c0_2 = arith.constant 0 : index
    %1 = vector.load %arg3[%c0_1, %c0_2] : memref<32x32xf32, #tpu.memory_space<vmem>>, vector<32x32xf32>
    %cst = arith.constant dense<0.000000e+00> : vector<16x32xf32>
    %2 = tpu.matmul %0, %1, %cst {dimension_numbers = #tpu.dot_dimension_numbers<[1], [0], [0], [1], [0, 0, 1, 1], [], []>} : vector<16x32xf32>, vector<32x32xf32>, vector<16x32xf32> -> vector<16x32xf32>
    %c0_3 = arith.constant 0 : index
    %c0_4 = arith.constant 0 : index
    %3 = vector.load %arg6[%c0_3, %c0_4] : memref<1x32xf32, #tpu.memory_space<vmem>>, vector<1x32xf32>
    %4 = vector.broadcast %3 : vector<1x32xf32> to vector<16x32xf32>
    %5 = arith.addf %2, %4 : vector<16x32xf32>
    %c0_5 = arith.constant 0 : index
    %c0_6 = arith.constant 0 : index
    %6 = vector.load %arg9[%c0_5, %c0_6] : memref<16x32xf32, #tpu.memory_space<vmem>>, vector<16x32xf32>
    tpu.vector_store %arg9[%c0_5, %c0_6], %5 {strides = array<i32>} : memref<16x32xf32, #tpu.memory_space<vmem>>, vector<16x32xf32>,
    %c0_7 = arith.constant 0 : index
    %c0_8 = arith.constant 0 : index
    %7 = vector.load %arg4[%c0_7, %c0_8] : memref<32x32xf32, #tpu.memory_space<vmem>>, vector<32x32xf32>
    %cst_9 = arith.constant dense<0.000000e+00> : vector<16x32xf32>
    %8 = tpu.matmul %0, %7, %cst_9 {dimension_numbers = #tpu.dot_dimension_numbers<[1], [0], [0], [1], [0, 0, 1, 1], [], []>} : vector<16x32xf32>, vector<32x32xf32>, vector<16x32xf32> -> vector<16x32xf32>
    %c0_10 = arith.constant 0 : index
    %c0_11 = arith.constant 0 : index
    %9 = vector.load %arg7[%c0_10, %c0_11] : memref<1x32xf32, #tpu.memory_space<vmem>>, vector<1x32xf32>
    %10 = vector.broadcast %9 : vector<1x32xf32> to vector<16x32xf32>
    %11 = arith.addf %8, %10 : vector<16x32xf32>
    %c0_12 = arith.constant 0 : index
    %c0_13 = arith.constant 0 : index
    %12 = vector.load %arg10[%c0_12, %c0_13] : memref<16x32xf32, #tpu.memory_space<vmem>>, vector<16x32xf32>
    tpu.vector_store %arg10[%c0_12, %c0_13], %11 {strides = array<i32>} : memref<16x32xf32, #tpu.memory_space<vmem>>, vector<16x32xf32>,
    %c0_14 = arith.constant 0 : index
    %c0_15 = arith.constant 0 : index
    %13 = vector.load %arg5[%c0_14, %c0_15] : memref<32x32xf32, #tpu.memory_space<vmem>>, vector<32x32xf32>
    %cst_16 = arith.constant dense<0.000000e+00> : vector<16x32xf32>
    %14 = tpu.matmul %0, %13, %cst_16 {dimension_numbers = #tpu.dot_dimension_numbers<[1], [0], [0], [1], [0, 0, 1, 1], [], []>} : vector<16x32xf32>, vector<32x32xf32>, vector<16x32xf32> -> vector<16x32xf32>
    %c0_17 = arith.constant 0 : index
    %c0_18 = arith.constant 0 : index
    %15 = vector.load %arg8[%c0_17, %c0_18] : memref<1x32xf32, #tpu.memory_space<vmem>>, vector<1x32xf32>
    %16 = vector.broadcast %15 : vector<1x32xf32> to vector<16x32xf32>
    %17 = arith.addf %14, %16 : vector<16x32xf32>
    %c0_19 = arith.constant 0 : index
    %c0_20 = arith.constant 0 : index
    %18 = vector.load %arg11[%c0_19, %c0_20] : memref<16x32xf32, #tpu.memory_space<vmem>>, vector<16x32xf32>
    tpu.vector_store %arg11[%c0_19, %c0_20], %17 {strides = array<i32>} : memref<16x32xf32, #tpu.memory_space<vmem>>, vector<16x32xf32>,
    return
  }
  func.func @transform_0(%arg0: i32, %arg1: i32) -> (i32, i32) {
    %c0_i32 = arith.constant 0 : i32
    %c0_i32_0 = arith.constant 0 : i32
    return %arg0, %c0_i32 : i32, i32
  }
  func.func @transform_1(%arg0: i32, %arg1: i32) -> (i32, i32) {
    %c0_i32 = arith.constant 0 : i32
    %c0_i32_0 = arith.constant 0 : i32
    return %c0_i32, %arg1 : i32, i32
  }
  func.func @transform_2(%arg0: i32, %arg1: i32) -> (i32, i32) {
    %c0_i32 = arith.constant 0 : i32
    %c0_i32_0 = arith.constant 0 : i32
    return %c0_i32, %arg1 : i32, i32
  }
  func.func @transform_3(%arg0: i32, %arg1: i32) -> (i32, i32) {
    %c0_i32 = arith.constant 0 : i32
    %c0_i32_0 = arith.constant 0 : i32
    return %c0_i32, %arg1 : i32, i32
  }
  func.func @transform_4(%arg0: i32, %arg1: i32) -> (i32, i32) {
    %c0_i32 = arith.constant 0 : i32
    %c0_i32_0 = arith.constant 0 : i32
    return %c0_i32, %arg1 : i32, i32
  }
  func.func @transform_5(%arg0: i32, %arg1: i32) -> (i32, i32) {
    %c0_i32 = arith.constant 0 : i32
    %c0_i32_0 = arith.constant 0 : i32
    return %c0_i32, %arg1 : i32, i32
  }
  func.func @transform_6(%arg0: i32, %arg1: i32) -> (i32, i32) {
    %c0_i32 = arith.constant 0 : i32
    %c0_i32_0 = arith.constant 0 : i32
    return %c0_i32, %arg1 : i32, i32
  }
  func.func @transform_7(%arg0: i32, %arg1: i32) -> (i32, i32) {
    %c0_i32 = arith.constant 0 : i32
    return %arg0, %arg1 : i32, i32
  }
  func.func @transform_8(%arg0: i32, %arg1: i32) -> (i32, i32) {
    %c0_i32 = arith.constant 0 : i32
    return %arg0, %arg1 : i32, i32
  }
  func.func @transform_9(%arg0: i32, %arg1: i32) -> (i32, i32) {
    %c0_i32 = arith.constant 0 : i32
    return %arg0, %arg1 : i32, i32
  }
}

</mosaic_0001>

<bundles_post_ra>
// kernel: tpu_custom_call.1
= control target key start
LH: loop header
LB: loop body
LE: loop exit
PB: predicated region body
PF: predicated region fallthrough
CT: control target
= control target key end

     0   :  { %15 = vsyncpa [#allocation3], 0  ;;  %s750_s0 = inlined_call_operand.hbm [shape: f32[16,32], index: 0, kind: input, shape index: {}]   ;;  %s751_s1 = inlined_call_operand.hbm [shape: f32[32,32], index: 1, kind: input, shape index: {}]   ;;  %s752_s2 = inlined_call_operand.hbm [shape: f32[32,32], index: 2, kind: input, shape index: {}]   ;;  %s753_s3 = inlined_call_operand.hbm [shape: f32[32,32], index: 3, kind: input, shape index: {}]   ;;  %s754_s4 = inlined_call_operand.vmem [shape: f32[1,32], index: 4, kind: input, shape index: {}]   ;;  %s755_s5 = inlined_call_operand.vmem [shape: f32[1,32], index: 5, kind: input, shape index: {}]   ;;  %s756_s6 = inlined_call_operand.vmem [shape: f32[1,32], index: 6, kind: input, shape index: {}]   ;;  %s757_s7 = inlined_call_operand.hbm [shape: f32[16,32], index: 7, kind: output, shape index: {0}]   ;;  %s758_s8 = inlined_call_operand.hbm [shape: f32[16,32], index: 8, kind: output, shape index: {1}]   ;;  %s759_s9 = inlined_call_operand.hbm [shape: f32[16,32], index: 9, kind: output, shape index: {2}]  }
   0x1   :  { %16 = vsyncpa [#allocation6], 0 }
   0x2   :  { %17 = vsyncpa [#allocation9], 0 }
   0x3   :  { %18 = vsyncpa [#allocation4], 0 }
   0x4   :  { %19 = vsyncpa [#allocation12], 0  ;;  %s628_s30 = smov [#allocation5]   ;;  %s629_s11 = smov [#allocation2]  }
   0x5   :  { %s37_s10 = sshll.u32 %s628_s30, 4  ;;  %s25_s12 = sshll.u32 %s629_s11, 4  ;;  %s38_s10 = int_to_ptr.vmem [resolvable:$true] %s37_s10  ;;  %s26_s12 = int_to_ptr.vmem [resolvable:$true] %s25_s12 }
   0x6   :  { %s486_s13 = scalar_lea.vmem %s38_s10, 512  ;;  %p491_p1 = scmp.lt.s32.totalorder %s38_s10, %s38_s10 }
   0x7   :  { %p487_p0 = scmp.ne.s32.totalorder %s38_s10, %s486_s13  ;;  %p492_p2 = scmp.lt.s32.totalorder %s486_s13, %s486_s13 }
   0x9   :  { %p493_p3 = por %p492_p2, %p491_p1 }
   0xb   :  { %p494_p4 = pnand %p493_p3, %p487_p0 }
   0xd   :  { %497 = shalt.err (!%p494_p4)
}
   0xe   :  { %s630_s14 = smov 128   ;;  %s631_s15 = smov 8  }
   0xf   :  { %43 = dma.hbm_to_vmem [thread:$0]  %s751_s1, 512, %s38_s10, [#allocation6], %s630_s14, %s630_s14, %s631_s15  }
  0x10   :  { %s506_s18 = scalar_lea.vmem %s26_s12, 256  ;;  %p511_p6 = scmp.lt.s32.totalorder %s26_s12, %s26_s12 }
  0x11   :  { %p507_p5 = scmp.ne.s32.totalorder %s26_s12, %s506_s18  ;;  %p512_p7 = scmp.lt.s32.totalorder %s506_s18, %s506_s18 }
  0x13   :  { %p513_p8 = por %p512_p7, %p511_p6 }
  0x15   :  { %p514_p9 = pnand %p513_p8, %p507_p5 }
  0x17   :  { %517 = shalt.err (!%p514_p9)
}
  0x18   :  { %31 = dma.hbm_to_vmem [thread:$0]  %s750_s0, 256, %s26_s12, [#allocation3], %s630_s14, %s630_s14, %s631_s15  }
  0x19   :  { %s632_s21 = smov [#allocation7]   ;;  %s633_s23 = smov [#allocation8]  }
  0x1a   :  { %s49_s22 = sshll.u32 %s632_s21, 4  ;;  %s61_s24 = sshll.u32 %s633_s23, 4  ;;  %s50_s22 = int_to_ptr.vmem [resolvable:$true] %s49_s22  ;;  %s62_s24 = int_to_ptr.vmem [resolvable:$true] %s61_s24 }
  0x1b   :  { %s526_s1 = scalar_lea.vmem %s50_s22, 512  ;;  %p531_p11 = scmp.lt.s32.totalorder %s50_s22, %s50_s22 }
  0x1c   :  { %p527_p10 = scmp.ne.s32.totalorder %s50_s22, %s526_s1  ;;  %p532_p12 = scmp.lt.s32.totalorder %s526_s1, %s526_s1 }
  0x1e   :  { %p533_p13 = por %p532_p12, %p531_p11 }
  0x20   :  { %p534_p0 = pnand %p533_p13, %p527_p10 }
  0x22   :  { %537 = shalt.err (!%p534_p0)
}
  0x23   :  { %55 = dma.hbm_to_vmem [thread:$0]  %s752_s2, 512, %s50_s22, [#allocation6], %s630_s14, %s630_s14, %s631_s15  }
  0x24   :  { %s546_s0 = scalar_lea.vmem %s62_s24, 512  ;;  %p551_p2 = scmp.lt.s32.totalorder %s62_s24, %s62_s24 }
  0x25   :  { %p547_p1 = scmp.ne.s32.totalorder %s62_s24, %s546_s0  ;;  %p552_p3 = scmp.lt.s32.totalorder %s546_s0, %s546_s0 }
  0x27   :  { %p553_p4 = por %p552_p3, %p551_p2 }
  0x29   :  { %p554_p5 = pnand %p553_p4, %p547_p1 }
  0x2b   :  { %557 = shalt.err (!%p554_p5)
}
  0x2c   :  { %67 = dma.hbm_to_vmem [thread:$0]  %s753_s3, 512, %s62_s24, [#allocation9], %s630_s14, %s630_s14, %s631_s15  }
  0x2d   :  { %618 = dma.done.wait [#allocation3], 256  }
  0x2e   :  { %619 = vsyncadd [#allocation3], 4294967040 }
  0x2f   :  { %620 = dma.done.wait [#allocation6], 1024  }
  0x30   :  { %621 = vsyncadd [#allocation6], 4294966272 }
  0x31   :  { %622 = dma.done.wait [#allocation9], 512  }
  0x32   :  { %623 = vsyncadd [#allocation9], 4294966784  ;;  %v91_v0 = vld [vmem:[#allocation5 + $0x18] sm:$0xff]  ;;  %v90_v1 = vld [vmem:[#allocation5 + $0x10] sm:$0xff]  ;;  %vm99_vm0 = vcmask 261120   ;;  %s634_s29 = smov [#allocation10]  }
  0x33   :  { %436 = vmatprep.subr.mxu0 %v91_v0  ;;  %v186_v2 = vld [vmem:[#allocation7 + $0x18] sm:$0xff]  ;;  %v86_v3 = vld [vmem:[#allocation2] sm:$0xff]  ;;  %v89_v4 = vld [vmem:[#allocation5 + $0x8] sm:$0xff]  ;;  %s364_s30 = sshll.u32 %s634_s29, 4  ;;  %s635_s12 = smov [#allocation11]   ;;  %s365_s30 = int_to_ptr.vmem [resolvable:$true] %s364_s30 }
  0x34   :  { %437 = vmatpush3.msra.mxu0 %v91_v0  ;;  %447 = vmatprep.subr.mxu1 %v186_v2  ;;  %v185_v5 = vld [vmem:[#allocation7 + $0x10] sm:$0xff]  ;;  %v88_v6 = vld [vmem:[#allocation5] sm:$0xff]  ;;  %v184_v7 = vld [vmem:[#allocation7 + $0x8] sm:$0xff]  ;;  %s376_s13 = sshll.u32 %s635_s12, 4  ;;  %s558_s17 = scalar_lea.vmem %s365_s30, 256  ;;  %s377_s13 = int_to_ptr.vmem [resolvable:$true] %s376_s13 }
  0x35   :  { %438 = vmatprep.subr.mxu0 %v90_v1  ;;  %448 = vmatpush3.msra.mxu1 %v186_v2  ;;  %v87_v8 = vld [vmem:[#allocation2 + $0x8] sm:$0xff]  ;;  %v183_v10 = vld [vmem:[#allocation7] sm:$0xff]  ;;  %v273_v11 = vld [vmem:[#allocation8 + $0x10] sm:$0xff]  ;;  %p559_p6 = scmp.ne.s32.totalorder %s365_s30, %s558_s17  ;;  %p563_p7 = scmp.lt.s32.totalorder %s365_s30, %s365_s30 }
  0x36   :  { %439 = vmatpush3.msra.mxu0 %v90_v1  ;;  %444 = vmatprep.mubr.msk.f32.mxu0 %vm99_vm0, %v86_v3  ;;  %v274_v9 = vld [vmem:[#allocation8 + $0x18] sm:$0xff]  ;;  %v272_v12 = vld [vmem:[#allocation8 + $0x8] sm:$0xff]  ;;  %v271_v13 = vld [vmem:[#allocation8] sm:$0xff]  ;;  %p564_p8 = scmp.lt.s32.totalorder %s558_s17, %s558_s17 }
  0x37   :  { %440 = vmatprep.subr.mxu0 %v89_v4  ;;  %449 = vmatprep.subr.mxu1 %v185_v5  ;;  %v409_v14 = vld [vmem:[%s754_s4] ss:$0 sm:$0xff] }
  0x38   :  { %441 = vmatpush3.msra.mxu0 %v89_v4  ;;  %450 = vmatpush3.msra.mxu1 %v185_v5  ;;  %v412_v18 = vld [vmem:[%s755_s5] ss:$0 sm:$0xff]  ;;  %p565_p9 = por %p564_p8, %p563_p7 }
  0x39   :  { %442 = vmatprep.subr.mxu0 %v88_v6  ;;  %451 = vmatprep.subr.mxu1 %v184_v7  ;;  %v415_v22 = vld [vmem:[%s756_s6] ss:$0 sm:$0xff] }
  0x3a   :  { %443 = vmatpush3.msra.mxu0 %v88_v6  ;;  %452 = vmatpush3.msra.mxu1 %v184_v7  ;;  %p566_p10 = pnand %p565_p9, %p559_p6 }
  0x3b   :  { %445 = vmatmul.mubr.msk.f32.vlgmr.msra.gmra.mxu0 %vm99_vm0, %v87_v8  ;;  %458 = vmatprep.subr.mxu0 %v274_v9 }
  0x3c   :  { %459 = vmatpush3.msra.mxu0 %v274_v9  ;;  %453 = vmatprep.subr.mxu1 %v183_v10 }
  0x3d   :  { %460 = vmatprep.subr.mxu0 %v273_v11  ;;  %454 = vmatpush3.msra.mxu1 %v183_v10 }
  0x3e   :  { %461 = vmatpush3.msra.mxu0 %v273_v11  ;;  %455 = vmatprep.mubr.msk.f32.mxu1 %vm99_vm0, %v86_v3 }
  0x3f   :  { %462 = vmatprep.subr.mxu0 %v272_v12  ;;  %456 = vmatmul.mubr.msk.f32.vlgmr.msra.gmra.mxu1 %vm99_vm0, %v87_v8 }
  0x40   :  { %463 = vmatpush3.msra.mxu0 %v272_v12  ;;  %466 = vmatprep.mubr.msk.f32.mxu0 %vm99_vm0, %v86_v3 }
  0x41   :  { %464 = vmatprep.subr.mxu0 %v271_v13 }
  0x42   :  { %465 = vmatpush3.msra.mxu0 %v271_v13 }
  0x43   :  { %467 = vmatmul.mubr.msk.f32.vlgmr.msra.gmra.mxu0 %vm99_vm0, %v87_v8 }
  0xfb   :  { %v446_v15 = vpop.f32.mrf.mxu0 }
  0xfc   :  { %v178_v16 = vadd.f32 %v446_v15, %v409_v14 }
  0xfd   :  { %v172_v17 = vpop.f32.mrf.mxu0 }
  0xfe   :  { %182 = vst.msk [vmem:[#allocation10 + $0x8] sm:$0xff] %vm99_vm0, %v178_v16  ;;  %v173_v19 = vadd.f32 %v409_v14, %v172_v17 }
  0xff   :  { %v457_v20 = vpop.f32.mrf.mxu1 }
 0x100   :  { %181 = vst.msk [vmem:[#allocation10] sm:$0xff] %vm99_vm0, %v173_v19  ;;  %v266_v21 = vadd.f32 %v457_v20, %v412_v18 }
 0x101   :  { %v260_v23 = vpop.f32.mrf.mxu1 }
 0x102   :  { %569 = shalt.err (!%p566_p10)
}
 0x103   :  { %370 = dma.vmem_to_hbm [thread:$0]  %s365_s30, 256, %s757_s7, [#allocation4], %s630_s14, %s630_s14, %s631_s15   ;;  %270 = vst.msk [vmem:[#allocation11 + $0x8] sm:$0xff] %vm99_vm0, %v266_v21  ;;  %v261_v24 = vadd.f32 %v412_v18, %v260_v23  ;;  %v468_v25 = vpop.f32.mrf.mxu0 }
 0x104   :  { %s636_s6 = smov [#allocation13]   ;;  %v354_v26 = vadd.f32 %v468_v25, %v415_v22  ;;  %s578_s20 = scalar_lea.vmem %s377_s13, 256 }
 0x105   :  { %s388_s19 = sshll.u32 %s636_s6, 4  ;;  %269 = vst.msk [vmem:[#allocation11] sm:$0xff] %vm99_vm0, %v261_v24  ;;  %v348_v27 = vpop.f32.mrf.mxu0  ;;  %p579_p11 = scmp.ne.s32.totalorder %s377_s13, %s578_s20  ;;  %s389_s19 = int_to_ptr.vmem [resolvable:$true] %s388_s19 }
 0x106   :  { %p583_p12 = scmp.lt.s32.totalorder %s377_s13, %s377_s13  ;;  %p584_p13 = scmp.lt.s32.totalorder %s578_s20, %s578_s20 }
 0x108   :  { %p585_p0 = por %p584_p13, %p583_p12 }
 0x10a   :  { %p586_p1 = pnand %p585_p0, %p579_p11 }
 0x10c   :  { %589 = shalt.err (!%p586_p1)
}
 0x10d   :  { %382 = dma.vmem_to_hbm [thread:$0]  %s377_s13, 256, %s758_s8, [#allocation12], %s630_s14, %s630_s14, %s631_s15   ;;  %358 = vst.msk [vmem:[#allocation13 + $0x8] sm:$0xff] %vm99_vm0, %v354_v26  ;;  %v349_v28 = vadd.f32 %v415_v22, %v348_v27 }
 0x10e   :  { %s598_s22 = scalar_lea.vmem %s389_s19, 256  ;;  %p603_p3 = scmp.lt.s32.totalorder %s389_s19, %s389_s19 }
 0x10f   :  { %357 = vst.msk [vmem:[#allocation13] sm:$0xff] %vm99_vm0, %v349_v28  ;;  %p599_p2 = scmp.ne.s32.totalorder %s389_s19, %s598_s22  ;;  %p604_p4 = scmp.lt.s32.totalorder %s598_s22, %s598_s22 }
 0x111   :  { %p605_p5 = por %p604_p4, %p603_p3 }
 0x113   :  { %p606_p6 = pnand %p605_p5, %p599_p2 }
 0x115   :  { %609 = shalt.err (!%p606_p6)
}
 0x116   :  { %394 = dma.vmem_to_hbm [thread:$0]  %s389_s19, 256, %s759_s9, [#allocation12], %s630_s14, %s630_s14, %s631_s15  }
 0x117   :  { %624 = dma.done.wait [#allocation4], 256  }
 0x118   :  { %625 = vsyncadd [#allocation4], 4294967040 }
 0x119   :  { %626 = dma.done.wait [#allocation12], 512  }
 0x11a   :  { %627 = vsyncadd [#allocation12], 4294966784 }
 0x11b   :  { %404 = vsyncpa [#allocation3], 1 }
 0x11c   :  { %405 = vsyncpa [#allocation6], 1 }
 0x11d   :  { %406 = vsyncpa [#allocation9], 1 }
 0x11e   :  { %407 = vsyncpa [#allocation4], 1 }
 0x11f   :  { %408 = vsyncpa [#allocation12], 1 }

</bundles_post_ra>
